<compile_context>
chip_gen: v7x
topology: tpu7x:2x2x1
jax: 0.10.0
libtpu: 0.0.40
codegen_flags: <defaults>
</compile_context>

<pallas_src>
import functools

import jax
import jax.numpy as jnp
from jax.experimental import pallas as pl
from jax.experimental.pallas import tpu as pltpu


def _round_up(x, m):
    return (x + m - 1) // m * m


def _pick_tile_rows(H, per_row_bytes, max_tile_rows=None, target_bytes=4 << 20):
    """Largest divisor of H whose streamed block stays under target_bytes."""
    cap = H if max_tile_rows is None else min(H, max(1, int(max_tile_rows)))
    cap = min(cap, max(1, target_bytes // max(per_row_bytes, 1)))
    th = 1
    for d in range(1, H + 1):
        if H % d == 0 and d <= cap:
            th = d
    return th


def _cnn_head_kernel(x_ref, wc_ref, bc_ref, wf_ref, bf_ref, out_ref, pooled_ref,
                     *, inv_hw: float, apply_softmax: bool):
    """One (batch-tile, row-tile) grid step.

    x_ref     : (TB, TH+2, W+2, Cin)  bf16 halo-padded input rows (no im2col in HBM)
    wc_ref    : (9, Cin, Cp)          bf16 conv weight, tap-major
    bc_ref    : (1, Cp)               f32  conv bias
    wf_ref    : (Cp, NCp)             bf16 fc weight
    bf_ref    : (1, NCp)              f32  fc bias (-1e30 in padded class columns)
    out_ref   : (1, TB, NCp)          f32  logits / probabilities (lane-dense)
    pooled_ref: (TB, Cp)              f32  scratch: running pooled sum per batch row
    """
    rt = pl.program_id(1)
    n_rt = pl.num_programs(1)
    TB, THp2, Wp2, Cin = x_ref.shape
    TH, W = THp2 - 2, Wp2 - 2
    Cp = wc_ref.shape[-1]
    n = TB * TH * W

    @pl.when(rt == 0)
    def _init():
        pooled_ref[...] = jnp.zeros_like(pooled_ref)

    x = x_ref[...]                                   # (TB, TH+2, W+2, Cin) bf16
    acc = jnp.zeros((n, Cp), jnp.float32)
    # 3x3 conv as 9 shifted VMEM views -> 9 accumulating MXU dots (f32 accumulator).
    for kh in range(3):
        for kw in range(3):
            xs = x[:, kh:kh + TH, kw:kw + W, :].reshape(n, Cin)
            acc = acc + jnp.dot(xs, wc_ref[kh * 3 + kw],
                                preferred_element_type=jnp.float32)
    conv = jnp.maximum(acc + bc_ref[...], 0.0)       # bias + ReLU (f32 VPU)

    # Running pooled sum (global average pool, scaled once in finalize).
    pooled_ref[...] += conv.reshape(TB, TH * W, Cp).sum(axis=1)

    @pl.when(rt == n_rt - 1)
    def _finalize():
        feat = (pooled_ref[...] * inv_hw).astype(jnp.bfloat16)       # (TB, Cp)
        logits = jnp.dot(feat, wf_ref[...],
                         preferred_element_type=jnp.float32) + bf_ref[...]
        if apply_softmax:
            m = jnp.max(logits, axis=1, keepdims=True)
            e = jnp.exp(logits - m)
            denom = jnp.sum(e, axis=1, keepdims=True)
            logits = e * pl.reciprocal(denom, approx=True)
        out_ref[...] = logits.reshape(out_ref.shape).astype(out_ref.dtype)


def model_forward(x_nchw, params, softmax: bool = False, max_tile_rows=None):
    """Equivalent of Model.forward(x, softmax=...). x is NCHW like PyTorch."""
    wc, bc, wf, bf = params
    B, Cin, H, W = x_nchw.shape
    Cout = wc.shape[-1]
    NC = wf.shape[-1]

    # Lane-dense channel / class padding (weights only -- streamed data stays at Cin).
    Cp = _round_up(Cout, 128)
    NCp = _round_up(NC, 128)

    # Batch tiling: keep >=2 parallel iterations whenever B >= 2 (v7x megacore).
    TB = 8 if B >= 16 else max(1, B // 2)
    Bp = _round_up(B, TB)
    n_bt = Bp // TB

    per_row_bytes = TB * (W + 2) * Cin * 2
    TH = _pick_tile_rows(H, per_row_bytes, max_tile_rows)
    n_rt = H // TH

    # NCHW -> NHWC, EARLY bf16 cast, 1-pixel halo zero-pad. No im2col in HBM.
    x = jnp.transpose(x_nchw, (0, 2, 3, 1)).astype(jnp.bfloat16)
    xp = jnp.pad(x, ((0, Bp - B), (1, 1), (1, 1), (0, 0)))
    if n_rt == 1:
        x_tiles = xp                                            # (Bp, H+2, W+2, Cin)
    else:
        # Row tiles with a 1-row halo, laid out (bt, rt, b-in-tile)-major so each
        # grid step reads one contiguous 4-D block.
        t = jnp.stack([xp[:, i * TH:i * TH + TH + 2] for i in range(n_rt)], axis=1)
        t = t.reshape(n_bt, TB, n_rt, TH + 2, W + 2, Cin).transpose(0, 2, 1, 3, 4, 5)
        x_tiles = t.reshape(n_bt * n_rt * TB, TH + 2, W + 2, Cin)

    wc_p = jnp.pad(wc.reshape(9, Cin, Cout).astype(jnp.bfloat16),
                   ((0, 0), (0, 0), (0, Cp - Cout)))
    bc_p = jnp.pad(bc.reshape(1, Cout).astype(jnp.float32), ((0, 0), (0, Cp - Cout)))
    wf_p = jnp.pad(wf.astype(jnp.bfloat16), ((0, Cp - Cout), (0, NCp - NC)))
    # Padded class columns get a very negative bias so softmax ignores them.
    bf_p = jnp.pad(bf.reshape(1, NC).astype(jnp.float32), ((0, 0), (0, NCp - NC)),
                   constant_values=-1e30)

    kernel = functools.partial(_cnn_head_kernel, inv_hw=1.0 / (H * W),
                               apply_softmax=softmax)

    flops = 2 * Bp * H * W * 9 * Cin * Cp + 2 * Bp * Cp * NCp
    bytes_accessed = (x_tiles.size * 2 + wc_p.size * 2 + bc_p.size * 4
                      + wf_p.size * 2 + bf_p.size * 4 + n_bt * TB * NCp * 4)
    cost = pl.CostEstimate(flops=int(flops),
                           transcendentals=int(Bp * NCp) if softmax else 0,
                           bytes_accessed=int(bytes_accessed))

    # Generation-aware VMEM budget: actual need (double-buffered input + resident
    # weights + intermediates) with headroom, clamped to <= 32 MiB (v7x-safe).
    x_block = TB * (TH + 2) * (W + 2) * Cin * 2
    w_bytes = wc_p.size * 2 + bc_p.size * 4 + wf_p.size * 2 + bf_p.size * 4
    inter = TB * TH * W * (Cp * 4 + Cin * 2) * 2
    vmem_need = 2 * x_block + 2 * w_bytes + 2 * TB * NCp * 4 + TB * Cp * 4 + inter
    vmem_limit = int(min(32 << 20, max(16 << 20, 4 * vmem_need)))

    out = pl.pallas_call(
        kernel,
        out_shape=jax.ShapeDtypeStruct((n_bt, TB, NCp), jnp.float32),
        grid_spec=pltpu.PrefetchScalarGridSpec(
            num_scalar_prefetch=0,
            grid=(n_bt, n_rt),
            in_specs=[
                pl.BlockSpec((TB, TH + 2, W + 2, Cin),
                             lambda bt, rt: (bt * n_rt + rt, 0, 0, 0)),
                pl.BlockSpec((9, Cin, Cp), lambda bt, rt: (0, 0, 0)),
                pl.BlockSpec((1, Cp), lambda bt, rt: (0, 0)),
                pl.BlockSpec((Cp, NCp), lambda bt, rt: (0, 0)),
                pl.BlockSpec((1, NCp), lambda bt, rt: (0, 0)),
            ],
            out_specs=pl.BlockSpec((1, TB, NCp), lambda bt, rt: (bt, 0, 0)),
            scratch_shapes=[pltpu.VMEM((TB, Cp), jnp.float32)],
        ),
        compiler_params=pltpu.CompilerParams(
            dimension_semantics=("parallel", "arbitrary"),
            vmem_limit_bytes=vmem_limit),
        cost_estimate=cost,
    )(x_tiles, wc_p, bc_p, wf_p, bf_p)

    return out.reshape(Bp, NCp)[:B, :NC]


def make_params(key, cin, hidden, num_classes):
    k1, k2, k3, k4 = jax.random.split(key, 4)
    wc = jax.random.normal(k1, (3, 3, cin, hidden), jnp.float32) * 0.1
    bc = jax.random.normal(k2, (1, hidden), jnp.float32) * 0.01
    wf = jax.random.normal(k3, (hidden, num_classes), jnp.float32) * 0.1
    bf = jax.random.normal(k4, (1, num_classes), jnp.float32) * 0.01
    return wc, bc, wf, bf


def reference_forward(x_nchw, params, softmax: bool = False):
    """Pure-JAX reference (mirrors bf16 MXU operands, f32 accumulation)."""
    wc, bc, wf, bf = params
    x = jnp.transpose(x_nchw, (0, 2, 3, 1)).astype(jnp.bfloat16)
    B, H, W, Cin = x.shape
    xp = jnp.pad(x, ((0, 0), (1, 1), (1, 1), (0, 0)))
    cols = [xp[:, kh:kh + H, kw:kw + W, :] for kh in range(3) for kw in range(3)]
    patches = jnp.concatenate(cols, axis=-1).reshape(B, H * W, 9 * Cin)
    wmat = wc.reshape(9 * Cin, -1).astype(jnp.bfloat16)
    conv = jnp.einsum('bpk,kc->bpc', patches, wmat,
                      preferred_element_type=jnp.float32)
    conv = jax.nn.relu(conv + bc.reshape(1, 1, -1))
    feat = conv.mean(axis=1)
    logits = jnp.dot(feat.astype(jnp.bfloat16), wf.astype(jnp.bfloat16),
                     preferred_element_type=jnp.float32) + bf.reshape(1, -1)
    if softmax:
        logits = jax.nn.softmax(logits, axis=1)
    return logits


if __name__ == "__main__":
    # Small shapes consistent with the module's image-classifier forward.
    B, CIN, H, W = 2, 4, 16, 16
    HIDDEN, NUM_CLASSES = 32, 8

    key = jax.random.PRNGKey(0)
    kx, kp = jax.random.split(key)
    x = jax.random.normal(kx, (B, CIN, H, W), jnp.float32)  # NCHW like PyTorch
    params = make_params(kp, CIN, HIDDEN, NUM_CLASSES)

    y_ref = reference_forward(x, params, softmax=False)
    p_ref = reference_forward(x, params, softmax=True)

    # logits path (softmax=False, default in Model.forward); max_tile_rows=8
    # exercises the multi-row-tile pooled-sum accumulator (grid = (2, 2)).
    y = model_forward(x, params, softmax=False, max_tile_rows=8)
    jax.block_until_ready(y)
    assert jnp.allclose(y, y_ref, atol=2e-2, rtol=2e-2), "logits mismatch"

    # probability path (softmax=True)
    p = model_forward(x, params, softmax=True, max_tile_rows=8)
    jax.block_until_ready(p)
    assert jnp.allclose(p, p_ref, atol=5e-3, rtol=2e-2), "softmax mismatch"

    # default auto tiling (single row tile, no pre-tiling copy)
    y2 = model_forward(x, params, softmax=False)
    jax.block_until_ready(y2)
    assert jnp.allclose(y2, y_ref, atol=2e-2, rtol=2e-2), "auto-tile mismatch"

    print("KERNEL_OK")
</pallas_src>

<mosaic_0001>
module attributes {stable_mosaic.version = 11 : i64} {
  func.func @_cnn_head_kernel(%arg0: i32, %arg1: i32, %arg2: memref<1x10x18x4xbf16, #tpu.memory_space<vmem>>, %arg3: memref<9x4x128xbf16, #tpu.memory_space<vmem>>, %arg4: memref<1x128xf32, #tpu.memory_space<vmem>>, %arg5: memref<128x128xbf16, #tpu.memory_space<vmem>>, %arg6: memref<1x128xf32, #tpu.memory_space<vmem>>, %arg7: memref<1x1x128xf32, #tpu.memory_space<vmem>>, %arg8: memref<1x128xf32, #tpu.memory_space<vmem>>) attributes {dimension_semantics = [#tpu.dimension_semantics<parallel>, #tpu.dimension_semantics<arbitrary>], iteration_bounds = array<i64: 2, 2>, scalar_prefetch = 0 : i64, scratch_operands = 1 : i64, tpu.core_type = #tpu.core_type<tc>, window_params = [{transform_indices = @transform_0, window_bounds = array<i64: 1, 10, 18, 4>}, {pipeline_mode = #tpu.pipeline_mode<synchronous>, transform_indices = @transform_1, window_bounds = array<i64: 9, 4, 128>}, {pipeline_mode = #tpu.pipeline_mode<synchronous>, transform_indices = @transform_2, window_bounds = array<i64: 1, 128>}, {pipeline_mode = #tpu.pipeline_mode<synchronous>, transform_indices = @transform_3, window_bounds = array<i64: 128, 128>}, {pipeline_mode = #tpu.pipeline_mode<synchronous>, transform_indices = @transform_4, window_bounds = array<i64: 1, 128>}, {transform_indices = @transform_5, window_bounds = array<i64: 1, 1, 128>}]} {
    %c0_i32 = arith.constant 0 : i32
    %0 = arith.cmpi eq, %arg1, %c0_i32 : i32
    %1 = arith.extui %0 : i1 to i32
    %c0_i32_0 = arith.constant 0 : i32
    %2 = arith.cmpi ne, %1, %c0_i32_0 : i32
    scf.if %2 {
      %cst_41 = arith.constant 0.000000e+00 : f32
      %72 = vector.broadcast %cst_41 : f32 to vector<1x128xf32>
      %c0_42 = arith.constant 0 : index
      %c0_43 = arith.constant 0 : index
      %73 = vector.load %arg8[%c0_42, %c0_43] : memref<1x128xf32, #tpu.memory_space<vmem>>, vector<1x128xf32>
      tpu.vector_store %arg8[%c0_42, %c0_43], %72 {strides = array<i32>} : memref<1x128xf32, #tpu.memory_space<vmem>>, vector<1x128xf32>,
    } else {
    }
    %c0 = arith.constant 0 : index
    %c0_1 = arith.constant 0 : index
    %c0_2 = arith.constant 0 : index
    %c0_3 = arith.constant 0 : index
    %3 = vector.load %arg2[%c0, %c0_1, %c0_2, %c0_3] : memref<1x10x18x4xbf16, #tpu.memory_space<vmem>>, vector<1x10x18x4xbf16>
    %cst = arith.constant 0.000000e+00 : f32
    %4 = vector.broadcast %cst : f32 to vector<128x128xf32>
    %5 = vector.extract_strided_slice %3 {offsets = [0, 0, 0, 0], sizes = [1, 8, 16, 4], strides = [1, 1, 1, 1]} : vector<1x10x18x4xbf16> to vector<1x8x16x4xbf16>
    %6 = vector.shape_cast %5 : vector<1x8x16x4xbf16> to vector<128x4xbf16>
    %c0_4 = arith.constant 0 : index
    %c0_5 = arith.constant 0 : index
    %c0_6 = arith.constant 0 : index
    %7 = vector.load %arg3[%c0_4, %c0_5, %c0_6] : memref<9x4x128xbf16, #tpu.memory_space<vmem>>, vector<1x4x128xbf16>
    %8 = vector.shape_cast %7 : vector<1x4x128xbf16> to vector<4x128xbf16>
    %cst_7 = arith.constant dense<0.000000e+00> : vector<128x128xf32>
    %9 = tpu.matmul %6, %8, %cst_7 {dimension_numbers = #tpu.dot_dimension_numbers<[1], [0], [0], [1], [0, 0, 1, 1], [], []>} : vector<128x4xbf16>, vector<4x128xbf16>, vector<128x128xf32> -> vector<128x128xf32>
    %10 = arith.addf %4, %9 : vector<128x128xf32>
    %11 = vector.extract_strided_slice %3 {offsets = [0, 0, 1, 0], sizes = [1, 8, 16, 4], strides = [1, 1, 1, 1]} : vector<1x10x18x4xbf16> to vector<1x8x16x4xbf16>
    %12 = vector.shape_cast %11 : vector<1x8x16x4xbf16> to vector<128x4xbf16>
    %c1 = arith.constant 1 : index
    %c0_8 = arith.constant 0 : index
    %c0_9 = arith.constant 0 : index
    %13 = vector.load %arg3[%c1, %c0_8, %c0_9] : memref<9x4x128xbf16, #tpu.memory_space<vmem>>, vector<1x4x128xbf16>
    %14 = vector.shape_cast %13 : vector<1x4x128xbf16> to vector<4x128xbf16>
    %cst_10 = arith.constant dense<0.000000e+00> : vector<128x128xf32>
    %15 = tpu.matmul %12, %14, %cst_10 {dimension_numbers = #tpu.dot_dimension_numbers<[1], [0], [0], [1], [0, 0, 1, 1], [], []>} : vector<128x4xbf16>, vector<4x128xbf16>, vector<128x128xf32> -> vector<128x128xf32>
    %16 = arith.addf %10, %15 : vector<128x128xf32>
    %17 = vector.extract_strided_slice %3 {offsets = [0, 0, 2, 0], sizes = [1, 8, 16, 4], strides = [1, 1, 1, 1]} : vector<1x10x18x4xbf16> to vector<1x8x16x4xbf16>
    %18 = vector.shape_cast %17 : vector<1x8x16x4xbf16> to vector<128x4xbf16>
    %c2 = arith.constant 2 : index
    %c0_11 = arith.constant 0 : index
    %c0_12 = arith.constant 0 : index
    %19 = vector.load %arg3[%c2, %c0_11, %c0_12] : memref<9x4x128xbf16, #tpu.memory_space<vmem>>, vector<1x4x128xbf16>
    %20 = vector.shape_cast %19 : vector<1x4x128xbf16> to vector<4x128xbf16>
    %cst_13 = arith.constant dense<0.000000e+00> : vector<128x128xf32>
    %21 = tpu.matmul %18, %20, %cst_13 {dimension_numbers = #tpu.dot_dimension_numbers<[1], [0], [0], [1], [0, 0, 1, 1], [], []>} : vector<128x4xbf16>, vector<4x128xbf16>, vector<128x128xf32> -> vector<128x128xf32>
    %22 = arith.addf %16, %21 : vector<128x128xf32>
    %23 = vector.extract_strided_slice %3 {offsets = [0, 1, 0, 0], sizes = [1, 8, 16, 4], strides = [1, 1, 1, 1]} : vector<1x10x18x4xbf16> to vector<1x8x16x4xbf16>
    %24 = vector.shape_cast %23 : vector<1x8x16x4xbf16> to vector<128x4xbf16>
    %c3 = arith.constant 3 : index
    %c0_14 = arith.constant 0 : index
    %c0_15 = arith.constant 0 : index
    %25 = vector.load %arg3[%c3, %c0_14, %c0_15] : memref<9x4x128xbf16, #tpu.memory_space<vmem>>, vector<1x4x128xbf16>
    %26 = vector.shape_cast %25 : vector<1x4x128xbf16> to vector<4x128xbf16>
    %cst_16 = arith.constant dense<0.000000e+00> : vector<128x128xf32>
    %27 = tpu.matmul %24, %26, %cst_16 {dimension_numbers = #tpu.dot_dimension_numbers<[1], [0], [0], [1], [0, 0, 1, 1], [], []>} : vector<128x4xbf16>, vector<4x128xbf16>, vector<128x128xf32> -> vector<128x128xf32>
    %28 = arith.addf %22, %27 : vector<128x128xf32>
    %29 = vector.extract_strided_slice %3 {offsets = [0, 1, 1, 0], sizes = [1, 8, 16, 4], strides = [1, 1, 1, 1]} : vector<1x10x18x4xbf16> to vector<1x8x16x4xbf16>
    %30 = vector.shape_cast %29 : vector<1x8x16x4xbf16> to vector<128x4xbf16>
    %c4 = arith.constant 4 : index
    %c0_17 = arith.constant 0 : index
    %c0_18 = arith.constant 0 : index
    %31 = vector.load %arg3[%c4, %c0_17, %c0_18] : memref<9x4x128xbf16, #tpu.memory_space<vmem>>, vector<1x4x128xbf16>
    %32 = vector.shape_cast %31 : vector<1x4x128xbf16> to vector<4x128xbf16>
    %cst_19 = arith.constant dense<0.000000e+00> : vector<128x128xf32>
    %33 = tpu.matmul %30, %32, %cst_19 {dimension_numbers = #tpu.dot_dimension_numbers<[1], [0], [0], [1], [0, 0, 1, 1], [], []>} : vector<128x4xbf16>, vector<4x128xbf16>, vector<128x128xf32> -> vector<128x128xf32>
    %34 = arith.addf %28, %33 : vector<128x128xf32>
    %35 = vector.extract_strided_slice %3 {offsets = [0, 1, 2, 0], sizes = [1, 8, 16, 4], strides = [1, 1, 1, 1]} : vector<1x10x18x4xbf16> to vector<1x8x16x4xbf16>
    %36 = vector.shape_cast %35 : vector<1x8x16x4xbf16> to vector<128x4xbf16>
    %c5 = arith.constant 5 : index
    %c0_20 = arith.constant 0 : index
    %c0_21 = arith.constant 0 : index
    %37 = vector.load %arg3[%c5, %c0_20, %c0_21] : memref<9x4x128xbf16, #tpu.memory_space<vmem>>, vector<1x4x128xbf16>
    %38 = vector.shape_cast %37 : vector<1x4x128xbf16> to vector<4x128xbf16>
    %cst_22 = arith.constant dense<0.000000e+00> : vector<128x128xf32>
    %39 = tpu.matmul %36, %38, %cst_22 {dimension_numbers = #tpu.dot_dimension_numbers<[1], [0], [0], [1], [0, 0, 1, 1], [], []>} : vector<128x4xbf16>, vector<4x128xbf16>, vector<128x128xf32> -> vector<128x128xf32>
    %40 = arith.addf %34, %39 : vector<128x128xf32>
    %41 = vector.extract_strided_slice %3 {offsets = [0, 2, 0, 0], sizes = [1, 8, 16, 4], strides = [1, 1, 1, 1]} : vector<1x10x18x4xbf16> to vector<1x8x16x4xbf16>
    %42 = vector.shape_cast %41 : vector<1x8x16x4xbf16> to vector<128x4xbf16>
    %c6 = arith.constant 6 : index
    %c0_23 = arith.constant 0 : index
    %c0_24 = arith.constant 0 : index
    %43 = vector.load %arg3[%c6, %c0_23, %c0_24] : memref<9x4x128xbf16, #tpu.memory_space<vmem>>, vector<1x4x128xbf16>
    %44 = vector.shape_cast %43 : vector<1x4x128xbf16> to vector<4x128xbf16>
    %cst_25 = arith.constant dense<0.000000e+00> : vector<128x128xf32>
    %45 = tpu.matmul %42, %44, %cst_25 {dimension_numbers = #tpu.dot_dimension_numbers<[1], [0], [0], [1], [0, 0, 1, 1], [], []>} : vector<128x4xbf16>, vector<4x128xbf16>, vector<128x128xf32> -> vector<128x128xf32>
    %46 = arith.addf %40, %45 : vector<128x128xf32>
    %47 = vector.extract_strided_slice %3 {offsets = [0, 2, 1, 0], sizes = [1, 8, 16, 4], strides = [1, 1, 1, 1]} : vector<1x10x18x4xbf16> to vector<1x8x16x4xbf16>
    %48 = vector.shape_cast %47 : vector<1x8x16x4xbf16> to vector<128x4xbf16>
    %c7 = arith.constant 7 : index
    %c0_26 = arith.constant 0 : index
    %c0_27 = arith.constant 0 : index
    %49 = vector.load %arg3[%c7, %c0_26, %c0_27] : memref<9x4x128xbf16, #tpu.memory_space<vmem>>, vector<1x4x128xbf16>
    %50 = vector.shape_cast %49 : vector<1x4x128xbf16> to vector<4x128xbf16>
    %cst_28 = arith.constant dense<0.000000e+00> : vector<128x128xf32>
    %51 = tpu.matmul %48, %50, %cst_28 {dimension_numbers = #tpu.dot_dimension_numbers<[1], [0], [0], [1], [0, 0, 1, 1], [], []>} : vector<128x4xbf16>, vector<4x128xbf16>, vector<128x128xf32> -> vector<128x128xf32>
    %52 = arith.addf %46, %51 : vector<128x128xf32>
    %53 = vector.extract_strided_slice %3 {offsets = [0, 2, 2, 0], sizes = [1, 8, 16, 4], strides = [1, 1, 1, 1]} : vector<1x10x18x4xbf16> to vector<1x8x16x4xbf16>
    %54 = vector.shape_cast %53 : vector<1x8x16x4xbf16> to vector<128x4xbf16>
    %c8 = arith.constant 8 : index
    %c0_29 = arith.constant 0 : index
    %c0_30 = arith.constant 0 : index
    %55 = vector.load %arg3[%c8, %c0_29, %c0_30] : memref<9x4x128xbf16, #tpu.memory_space<vmem>>, vector<1x4x128xbf16>
    %56 = vector.shape_cast %55 : vector<1x4x128xbf16> to vector<4x128xbf16>
    %cst_31 = arith.constant dense<0.000000e+00> : vector<128x128xf32>
    %57 = tpu.matmul %54, %56, %cst_31 {dimension_numbers = #tpu.dot_dimension_numbers<[1], [0], [0], [1], [0, 0, 1, 1], [], []>} : vector<128x4xbf16>, vector<4x128xbf16>, vector<128x128xf32> -> vector<128x128xf32>
    %58 = arith.addf %52, %57 : vector<128x128xf32>
    %c0_32 = arith.constant 0 : index
    %c0_33 = arith.constant 0 : index
    %59 = vector.load %arg4[%c0_32, %c0_33] : memref<1x128xf32, #tpu.memory_space<vmem>>, vector<1x128xf32>
    %60 = vector.broadcast %59 : vector<1x128xf32> to vector<128x128xf32>
    %61 = arith.addf %58, %60 : vector<128x128xf32>
    %cst_34 = arith.constant 0.000000e+00 : f32
    %62 = vector.broadcast %cst_34 : f32 to vector<128x128xf32>
    %63 = arith.maximumf %61, %62 : vector<128x128xf32>
    %c0_35 = arith.constant 0 : index
    %c0_36 = arith.constant 0 : index
    %64 = vector.load %arg8[%c0_35, %c0_36] : memref<1x128xf32, #tpu.memory_space<vmem>>, vector<1x128xf32>
    %65 = vector.shape_cast %63 : vector<128x128xf32> to vector<1x128x128xf32>
    %cst_37 = arith.constant dense<0.000000e+00> : vector<1x128xf32>
    %66 = vector.multi_reduction <add>, %65, %cst_37 [1] : vector<1x128x128xf32> to vector<1x128xf32>
    %67 = arith.addf %64, %66 : vector<1x128xf32>
    %c0_38 = arith.constant 0 : index
    %c0_39 = arith.constant 0 : index
    %68 = vector.load %arg8[%c0_38, %c0_39] : memref<1x128xf32, #tpu.memory_space<vmem>>, vector<1x128xf32>
    tpu.vector_store %arg8[%c0_38, %c0_39], %67 {strides = array<i32>} : memref<1x128xf32, #tpu.memory_space<vmem>>, vector<1x128xf32>,
    %c1_i32 = arith.constant 1 : i32
    %69 = arith.cmpi eq, %arg1, %c1_i32 : i32
    %70 = arith.extui %69 : i1 to i32
    %c0_i32_40 = arith.constant 0 : i32
    %71 = arith.cmpi ne, %70, %c0_i32_40 : i32
    scf.if %71 {
      %c0_41 = arith.constant 0 : index
      %c0_42 = arith.constant 0 : index
      %72 = vector.load %arg8[%c0_41, %c0_42] : memref<1x128xf32, #tpu.memory_space<vmem>>, vector<1x128xf32>
      %cst_43 = arith.constant 3.906250e-03 : f32
      %73 = vector.broadcast %cst_43 : f32 to vector<1x128xf32>
      %74 = arith.mulf %72, %73 : vector<1x128xf32>
      %75 = arith.truncf %74 : vector<1x128xf32> to vector<1x128xbf16>
      %c0_44 = arith.constant 0 : index
      %c0_45 = arith.constant 0 : index
      %76 = vector.load %arg5[%c0_44, %c0_45] : memref<128x128xbf16, #tpu.memory_space<vmem>>, vector<128x128xbf16>
      %cst_46 = arith.constant dense<0.000000e+00> : vector<1x128xf32>
      %77 = tpu.matmul %75, %76, %cst_46 {dimension_numbers = #tpu.dot_dimension_numbers<[1], [0], [0], [1], [0, 0, 1, 1], [], []>} : vector<1x128xbf16>, vector<128x128xbf16>, vector<1x128xf32> -> vector<1x128xf32>
      %c0_47 = arith.constant 0 : index
      %c0_48 = arith.constant 0 : index
      %78 = vector.load %arg6[%c0_47, %c0_48] : memref<1x128xf32, #tpu.memory_space<vmem>>, vector<1x128xf32>
      %79 = arith.addf %77, %78 : vector<1x128xf32>
      %80 = vector.shape_cast %79 : vector<1x128xf32> to vector<1x1x128xf32>
      %c0_49 = arith.constant 0 : index
      %c0_50 = arith.constant 0 : index
      %c0_51 = arith.constant 0 : index
      %81 = vector.load %arg7[%c0_49, %c0_50, %c0_51] : memref<1x1x128xf32, #tpu.memory_space<vmem>>, vector<1x1x128xf32>
      tpu.vector_store %arg7[%c0_49, %c0_50, %c0_51], %80 {strides = array<i32>} : memref<1x1x128xf32, #tpu.memory_space<vmem>>, vector<1x1x128xf32>,
    } else {
    }
    return
  }
  func.func @transform_0(%arg0: i32, %arg1: i32) -> (i32, i32, i32, i32) {
    %c2_i32 = arith.constant 2 : i32
    %0 = arith.muli %arg0, %c2_i32 : i32
    %1 = arith.addi %0, %arg1 : i32
    %c0_i32 = arith.constant 0 : i32
    %c0_i32_0 = arith.constant 0 : i32
    %c0_i32_1 = arith.constant 0 : i32
    %c0_i32_2 = arith.constant 0 : i32
    return %1, %c0_i32, %c0_i32_0, %c0_i32_1 : i32, i32, i32, i32
  }
  func.func @transform_1(%arg0: i32, %arg1: i32) -> (i32, i32, i32) {
    %c0_i32 = arith.constant 0 : i32
    %c0_i32_0 = arith.constant 0 : i32
    %c0_i32_1 = arith.constant 0 : i32
    %c0_i32_2 = arith.constant 0 : i32
    return %c0_i32, %c0_i32_0, %c0_i32_1 : i32, i32, i32
  }
  func.func @transform_2(%arg0: i32, %arg1: i32) -> (i32, i32) {
    %c0_i32 = arith.constant 0 : i32
    %c0_i32_0 = arith.constant 0 : i32
    %c0_i32_1 = arith.constant 0 : i32
    return %c0_i32, %c0_i32_0 : i32, i32
  }
  func.func @transform_3(%arg0: i32, %arg1: i32) -> (i32, i32) {
    %c0_i32 = arith.constant 0 : i32
    %c0_i32_0 = arith.constant 0 : i32
    %c0_i32_1 = arith.constant 0 : i32
    return %c0_i32, %c0_i32_0 : i32, i32
  }
  func.func @transform_4(%arg0: i32, %arg1: i32) -> (i32, i32) {
    %c0_i32 = arith.constant 0 : i32
    %c0_i32_0 = arith.constant 0 : i32
    %c0_i32_1 = arith.constant 0 : i32
    return %c0_i32, %c0_i32_0 : i32, i32
  }
  func.func @transform_5(%arg0: i32, %arg1: i32) -> (i32, i32, i32) {
    %c0_i32 = arith.constant 0 : i32
    %c0_i32_0 = arith.constant 0 : i32
    %c0_i32_1 = arith.constant 0 : i32
    return %arg0, %c0_i32, %c0_i32_0 : i32, i32, i32
  }
}

</mosaic_0001>

<bundles_post_ra>
// kernel: tpu_custom_call.1
= control target key start
LH: loop header
LB: loop body
LE: loop exit
PB: predicated region body
PF: predicated region fallthrough
CT: control target
= control target key end

     0   :  { %10 = vsyncpa [#allocation4], 0  ;;  %s3585_s0 = inlined_call_operand.vmem [shape: bf16[4,10,18,4], index: 0, kind: input, shape index: {}]   ;;  %s3586_s1 = inlined_call_operand.vmem [shape: bf16[9,4,128], index: 1, kind: input, shape index: {}]   ;;  %s3587_s2 = inlined_call_operand.vmem [shape: f32[1,128], index: 2, kind: input, shape index: {}]   ;;  %s3588_s3 = inlined_call_operand.vmem [shape: bf16[128,128], index: 3, kind: input, shape index: {}]   ;;  %s3589_s4 = inlined_call_operand.vmem [shape: f32[1,128], index: 4, kind: input, shape index: {}]   ;;  %s3590_s5 = inlined_call_operand.hbm [shape: f32[2,1,128], index: 5, kind: output, shape index: {}]  }
   0x1   :  { %12 = vsyncpa [#allocation4 + $0x1], 0  ;;  %s2874_s18 = smov 0   ;;  %s2876_s19 = smov 0  }
   0x2   :  { %s2878_s20 = smov 0   ;;  %s2880_s21 = smov 0  }
   0x3   :  { %s2882_s22 = smov 0   ;;  %s2884_s23 = smov 0  }
   0x4   :  { %s2886_s24 = smov 0   ;;  %s2888_s25 = smov 0  }
   0x5 LB: > { %s2096_s26 = sadd.s32 4294967295, %s2838_s25   ;;  %s2097_s27 = sadd.s32 4294967294, %s2838_s25   ;;  %s2838_s25 = sphi %s2888_s25, %s18_s25   ;;  %s2834_s24 = sphi %s2886_s24, %s3603_s24   ;;  %s2830_s23 = sphi %s2884_s23, %s3602_s23   ;;  %s2826_s22 = sphi %s2882_s22, %s3601_s22   ;;  %s2822_s21 = sphi %s2880_s21, %s3600_s21   ;;  %s2818_s20 = sphi %s2878_s20, %s3599_s20   ;;  %s2814_s19 = sphi %s2876_s19, %s3598_s19   ;;  %s2810_s18 = sphi %s2874_s18, %s3597_s18  }
   0x6   : > { %s27_s28 = sadd.s32 1, %s2830_s23  ;;  %s30_s29 = sadd.s32 1, %s2834_s24 }
   0x7   : > { %p28_p0 = scmp.ge.s32.totalorder %s27_s28, 2  ;;  %p161_p1 = scmp.ne.s32.totalorder %s2818_s20, %s2814_s19 }
   0x8   : > { %p162_p2 = scmp.eq.s32.totalorder %s2096_s26, 3  ;;  %p167_p4 = scmp.ne.s32.totalorder %s2814_s19, %s2810_s18 }
   0x9   : > { %s3605_s28 = smov (%p28_p0, %s27_s28), 0  ;;  %s3607_s29 = smov (!%p28_p0, %s30_s29), %s2834_s24 }
   0xa   : > { %p2923_p3 = por %p162_p2, %p161_p1  ;;  %p32_p5 = scmp.ge.s32.totalorder %s3607_s29, 2 }
   0xb   : > { %p168_p6 = scmp.eq.s32.totalorder %s2097_s27, 3  ;;  %p2102_p7 = scmp.ge.s32.totalorder %s2838_s25, 1 }
   0xc   : > { %p210_p8 = scmp.lt.s32.totalorder %s2838_s25, 5  ;;  %s3609_s29 = smov (%p32_p5, %s3607_s29), 0 }
   0xd   : > { %p2933_p9 = por %p168_p6, %p167_p4  ;;  %s148_s7 = ssub.s32 %s2834_s24, %s3609_s29 }
   0xe   : > { %p211_p10 = pnand %p2102_p7, %p210_p8  ;;  %s151_s8 = sadd.s32 1, %s2818_s20 }
   0xf   : > { %p149_p11 = scmp.eq.s32.totalorder %s148_s7, 0  ;;  %s237_s10 = sand.u32 (!%p211_p10), 1, %s2814_s19  }
  0x10   : > { %214 = sbr.rel (%p211_p10) target bundleno = 684 (0x2ac), region = 40  ;;  %s2103_s11 = sshll.u32 (!%p211_p10), %s2826_s22, 1 }
  0x11   : > { %s2941_s9 = scalar_select %p149_p11, %s2818_s20, %s151_s8  }
  0x12   : > { %s240_s12 = sadd.s32 (!%p211_p10), %s2822_s21, %s2103_s11  ;;  %s2953_s17 = scalar_lea.vmem (!%p211_p10), [#allocation3], %s237_s10 }
  0x13   : > { %p241_p12 = scmp.lt.s32.totalorder (!%p211_p10), %s240_s12, 3  ;;  %p2105_p13 = scmp.ne.s32.totalorder (!%p211_p10), %s2822_s21, 0 }
  0x17   : > { %s3611_s12 = smov (!%p241_p12, %s240_s12), 3  ;;  %252 = sbr.rel (%p2105_p13) target bundleno = 30 (0x1e), region = 44 }
  0x18   : > { %s2651_s13 = smul.u32 120, %s3611_s12  ;;  %v2840_v0 = vmov (!%p2105_p13), 0.0  }
  0x19   : > { %253 = vst [vmem:[#allocation2] sm:$0x1] (!%p2105_p13), %v2840_v0 }
  0x1a   : > { %s2949_s16 = scalar_lea.vmem %s3585_s0, %s2651_s13 }
  0x1e PF: > { %v2106_v1 = vld [vmem:[%s3586_s1 + $0x2] sm:$0x3]  ;;  %vm531_vm0 = vcmask 1041408   ;;  %v2962_v2 = vld [vmem:[%s3586_s1 + $0x8] sm:$0x3]  ;;  %vm506_vm4 = vcmask 31744  }
  0x1f   : > { %2641 = vmatprep.subr.msk.bf16.mxu1 %vm531_vm0, %v2106_v1  ;;  %2645 = vmatprep.subr.msk.bf16.mxu0 %vm531_vm0, %v2962_v2  ;;  %v533_v3 = vsel %vm531_vm0, %v2106_v1, 0  ;;  %v2970_v4 = vsel %vm531_vm0, %v2962_v2, 0  ;;  %v2973_v5 = vld [vmem:[%s2949_s16] sm:$0xf]  ;;  %v2976_v6 = vld [vmem:[%s2949_s16 + $0x4] sm:$0xf] }
  0x20   : > { %2330 = vmatpush3.bf16.msra.mxu1 %v533_v3  ;;  %2402 = vmatpush3.bf16.msra.mxu0 %v2970_v4  ;;  %v2980_v7 = vld [vmem:[%s2949_s16 + $0x8] sm:$0x1]  ;;  %vm285_vm1 = vsmask.f32 3328  ;;  %vm286_vm2 = vsmask.f32 7440 }
  0x21   : > { %v289_v8 = vshrl.u32 %v2973_v5, 16  ;;  %v292_v9 = vshll.u32 %v2973_v5, 16  ;;  %v298_v10 = vshll.u32 %v2976_v6, 16  ;;  %v302_v11 = vshrl.u32 %v2976_v6, 16  ;;  %v284_v12 = vld [vmem:[%s3586_s1] sm:$0x3]  ;;  %vm3014_vm3 = vmor %vm285_vm1, %vm286_vm2 }
  0x22   : > { %v308_v13 = vshll.u32 %v2980_v7, 16  ;;  %2642 = vmatprep.subr.msk.bf16.mxu1 %vm531_vm0, %v284_v12  ;;  %v2992_v14 = vld [vmem:[%s2949_s16 + $0xc] sm:$0xf]  ;;  %v2995_v15 = vld [vmem:[%s2949_s16 + $0x10] sm:$0xf]  ;;  %v697_v42 = vsel %vm531_vm0, %v284_v12, 0 }
  0x23   : > { %v291_v16 = vrot.slane %v289_v8, 4  ;;  %v294_v17 = vrot.slane %v292_v9, 5  ;;  %v300_v18 = vrot.slane %v298_v10, 5  ;;  %v304_v19 = vrot.slane %v302_v11, 4  ;;  %v2998_v20 = vld [vmem:[%s2949_s16 + $0x14] sm:$0x1] }
  0x24   : > { %v310_v21 = vrot.slane %v308_v13, 5  ;;  %v313_v22 = vshrl.u32 %v2992_v14, 16  ;;  %v316_v23 = vshll.u32 %v2992_v14, 16  ;;  %v322_v24 = vshll.u32 %v2995_v15, 16  ;;  %v2185_v25 = vld [vmem:[%s3586_s1 + $0xa] sm:$0x3] }
  0x25   : > { %v295_v26 = vor.u32 %v294_v17, %v291_v16  ;;  %v305_v27 = vor.u32 %v304_v19, %v300_v18  ;;  %v326_v28 = vshrl.u32 %v2995_v15, 16  ;;  %v332_v29 = vshll.u32 %v2998_v20, 16  ;;  %2647 = vmatprep.subr.msk.bf16.mxu0 %vm531_vm0, %v2185_v25  ;;  %v3010_v30 = vld [vmem:[%s2949_s16 + $0x18] sm:$0xf]  ;;  %v3019_v39 = vld [vmem:[%s2949_s16 + $0x1c] sm:$0xf] }
  0x26   : > { %v315_v32 = vrot.slane %v313_v22, 4  ;;  %v318_v33 = vrot.slane %v316_v23, 5  ;;  %v324_v34 = vrot.slane %v322_v24, 5  ;;  %v819_v41 = vrot.slane %v2998_v20, 5  ;;  %v3024_v43 = vld [vmem:[%s2949_s16 + $0x20] sm:$0x1] }
  0x27   : > { %v296_v35 = vrot.slane %v295_v26, 4  ;;  %v306_v36 = vrot.slane %v305_v27, 4  ;;  %v328_v37 = vrot.slane %v326_v28, 4  ;;  %v334_v38 = vrot.slane %v332_v29, 5  ;;  %v3036_v57 = vld [vmem:[%s2949_s16 + $0x24] sm:$0xf] }
  0x28   : > { %v319_v40 = vor.u32 %v318_v33, %v315_v32  ;;  %v337_v44 = vshrl.u32 %v3010_v30, 16  ;;  %v340_v48 = vshll.u32 %v3010_v30, 16  ;;  %v346_v52 = vshll.u32 %v3019_v39, 16  ;;  %v3044_v62 = vld [vmem:[%s2949_s16 + $0x28] sm:$0xf]  ;;  %p2227_p0 = scmp.ne.s32.totalorder %s2822_s21, 1 }
  0x29   : > { %v301_v45 = vsel %vm3014_vm3, %v296_v35, %v300_v18  ;;  %v311_v46 = vsel %vm3014_vm3, %v306_v36, %v310_v21  ;;  %v329_v47 = vor.u32 %v328_v37, %v324_v34  ;;  %v350_v55 = vshrl.u32 %v3019_v39, 16  ;;  %v3049_v8 = vld [vmem:[%s2949_s16 + $0x2c] sm:$0x1]  ;;  %v3052_v9 = vld [vmem:[%s2949_s16 + $0x30] sm:$0xf] }
  0x2a   : > { %v2107_v49 = vcombine.low %v301_v45, %v311_v46  ;;  %v320_v50 = vrot.slane %v319_v40, 4  ;;  %v339_v51 = vrot.slane %v337_v44, 4  ;;  %v342_v54 = vrot.slane %v340_v48, 5  ;;  %v3063_v24 = vld [vmem:[%s2949_s16 + $0x34] sm:$0xf] }
  0x2b   : > { %v330_v53 = vrot.slane %v329_v47, 4  ;;  %v356_v56 = vshll.u32 %v3024_v43, 16  ;;  %v348_v59 = vrot.slane %v346_v52, 5  ;;  %v823_v60 = vrot.slane %v3019_v39, 5  ;;  %v3069_v32 = vld [vmem:[%s2949_s16 + $0x38] sm:$0x1] }
  0x2c   : > { %2331 = vmatprep.mubr.msk.bf16.mxu1 %vm506_vm4, %v2107_v49  ;;  %v325_v58 = vsel %vm3014_vm3, %v320_v50, %v324_v34  ;;  %v826_v61 = vrot.slane %v3024_v43, 5  ;;  %v343_v0 = vor.u32 %v342_v54, %v339_v51  ;;  %v352_v1 = vrot.slane %v350_v55, 4  ;;  %v2195_v44 = vld [vmem:[%s3586_s1 + $0xc] sm:$0x3]  ;;  %v3085_v49 = vld [vmem:[%s3586_s1 + $0x4] sm:$0x3] }
  0x2d   : > { %v335_v63 = vsel %vm3014_vm3, %v330_v53, %v334_v38  ;;  %v358_v3 = vrot.slane %v356_v56, 5  ;;  %v1320_v11 = vsel %vm531_vm0, %v2185_v25, 0  ;;  %v361_v12 = vshrl.u32 %v3036_v57, 16  ;;  %v3088_v53 = vld [vmem:[%s2949_s16 + $0x3c] sm:$0xf] }
  0x2e   : > { %v2108_v10 = vcombine.low %v325_v58, %v335_v63  ;;  %v364_v13 = vshll.u32 %v3036_v57, 16  ;;  %v344_v16 = vrot.slane %v343_v0, 4  ;;  %v353_v17 = vor.u32 %v352_v1, %v348_v59  ;;  %v3099_v58 = vld [vmem:[%s2949_s16 + $0x40] sm:$0xf] }
  0x2f   : > { %v370_v18 = vshll.u32 %v3044_v62, 16  ;;  %v374_v19 = vshrl.u32 %v3044_v62, 16  ;;  %v363_v21 = vrot.slane %v361_v12, 4  ;;  %v380_v23 = vshll.u32 %v3049_v8, 16  ;;  %v3484_v0 = vld [vmem:[%s3587_s2] ss:$0 sm:$0xff] }
  0x30   : > { %2403 = vmatprep.mubr.msk.bf16.mxu0 %vm506_vm4, %v2108_v10  ;;  %2332 = vmatmul.mubr.msk.bf16.vlgmr.msra.gmra.mrb[0].mxu1 %vm506_vm4, %v2108_v10  ;;  %v366_v22 = vrot.slane %v364_v13, 5  ;;  %v385_v25 = vshrl.u32 %v3052_v9, 16  ;;  %v349_v26 = vsel %vm3014_vm3, %v344_v16, %v348_v59  ;;  %v354_v27 = vrot.slane %v353_v17, 4  ;;  %v3113_v13 = vld [vmem:[%s2949_s16 + $0x44] sm:$0x1] }
  0x31   : > { %2348 = vmatpush3.bf16.msra.mxu1 %v697_v42  ;;  %v372_v28 = vrot.slane %v370_v18, 5  ;;  %v376_v29 = vrot.slane %v374_v19, 4  ;;  %v382_v34 = vrot.slane %v380_v23, 5  ;;  %v388_v36 = vshll.u32 %v3052_v9, 16 }
  0x32   : > { %v367_v33 = vor.u32 %v366_v22, %v363_v21  ;;  %v387_v35 = vrot.slane %v385_v25, 4  ;;  %v359_v37 = vsel %vm3014_vm3, %v354_v27, %v358_v3  ;;  %v394_v40 = vshll.u32 %v3063_v24, 16  ;;  %2643 = vmatprep.subr.msk.bf16.mxu1 %vm531_vm0, %v3085_v49 }
  0x33   : > { %v377_v38 = vor.u32 %v376_v29, %v372_v28  ;;  %v398_v42 = vshrl.u32 %v3063_v24, 16  ;;  %v3079_v45 = vcombine.low %v349_v26, %v359_v37  ;;  %v390_v47 = vrot.slane %v388_v36, 5 }
  0x34   : > { %v368_v46 = vrot.slane %v367_v33, 4  ;;  %v404_v48 = vshll.u32 %v3069_v32, 16  ;;  %v396_v51 = vrot.slane %v394_v40, 5  ;;  %vm804_vm5 = vcmask 1042432   ;;  %v3142_v40 = vld [vmem:[%s2949_s16 + $0x4c] sm:$0xf] }
  0x35   : > { %v378_v50 = vrot.slane %v377_v38, 4  ;;  %v400_v52 = vrot.slane %v398_v42, 4  ;;  %2404 = vmatmul.mubr.msk.bf16.vlgmr.msra.gmra.mrb[0].mxu0 %vm506_vm4, %v3079_v45  ;;  %2335 = vmatprep.mubr.msk.bf16.mxu1 %vm506_vm4, %v3079_v45  ;;  %v391_v55 = vor.u32 %v390_v47, %v387_v35  ;;  %vm805_vm6 = vcmask 1046532  }
  0x36   : > { %v373_v54 = vsel %vm3014_vm3, %v368_v46, %v372_v28  ;;  %v406_v56 = vrot.slane %v404_v48, 5  ;;  %2420 = vmatpush3.bf16.msra.mxu0 %v1320_v11  ;;  %vm3103_vm7 = vmor %vm804_vm5, %vm805_vm6  ;;  %v2140_v1 = vrot.slane %v2992_v14, 9  ;;  %v816_v3 = vrot.slane %v2995_v15, 5 }
  0x37   : > { %v383_v59 = vsel %vm3014_vm3, %v378_v50, %v382_v34  ;;  %v401_v63 = vor.u32 %v400_v52, %v396_v51  ;;  %v392_v12 = vrot.slane %v391_v55, 4  ;;  %2648 = vmatprep.subr.msk.bf16.mxu0 %vm531_vm0, %v2195_v44  ;;  %v409_v11 = vshrl.u32 %v3088_v53, 16  ;;  %v3135_v34 = vld [vmem:[%s2949_s16 + $0x48] sm:$0xf]  ;;  %v3153_v50 = vld [vmem:[%s2949_s16 + $0x50] sm:$0x1] }
  0x38   : > { %v3109_v10 = vcombine.low %v373_v54, %v383_v59  ;;  %v412_v16 = vshll.u32 %v3088_v53, 16  ;;  %v817_v18 = vsel %vm3103_vm7, %v2140_v1, %v816_v3  ;;  %v818_v19 = vrot.slane %v816_v3, 4 }
  0x39   : > { %v402_v17 = vrot.slane %v401_v63, 4  ;;  %v418_v21 = vshll.u32 %v3099_v58, 16  ;;  %v397_v22 = vsel %vm3014_vm3, %v392_v12, %v396_v51  ;;  %v411_v23 = vrot.slane %v409_v11, 4 }
  0x3a   : > { %2407 = vmatprep.mubr.msk.bf16.mxu0 %vm506_vm4, %v3109_v10  ;;  %2336 = vmatmul.mubr.msk.bf16.gmra.mrb[4].mxu1 %vm506_vm4, %v3109_v10  ;;  %v414_v25 = vrot.slane %v412_v16, 5  ;;  %v422_v26 = vshrl.u32 %v3099_v58, 16  ;;  %v820_v28 = vsel %vm3103_vm7, %v818_v19, %v819_v41  ;;  %v428_v33 = vshll.u32 %v3113_v13, 16  ;;  %v3175_v16 = vld [vmem:[%s2949_s16 + $0x54] sm:$0xf] }
  0x3b   : > { %v407_v27 = vsel %vm3014_vm3, %v402_v17, %v406_v56  ;;  %v420_v29 = vrot.slane %v418_v21, 5  ;;  %v3139_v36 = vcombine.low %v817_v18, %v820_v28  ;;  %v2141_v20 = vrot.slane %v3010_v30, 9  ;;  %v3183_v21 = vld [vmem:[%s2949_s16 + $0x58] sm:$0xf] }
  0x3c   : > { %v3137_v35 = vcombine.low %v397_v22, %v407_v27  ;;  %v415_v37 = vor.u32 %v414_v25, %v411_v23  ;;  %v424_v38 = vrot.slane %v422_v26, 4  ;;  %v430_v42 = vrot.slane %v428_v33, 5  ;;  %v3188_v27 = vld [vmem:[%s2949_s16 + $0x5c] sm:$0x1] }
  0x3d   : > { %v825_v41 = vrot.slane %v823_v60, 4  ;;  %v1446_v46 = vsel %vm531_vm0, %v2195_v44, 0  ;;  %v433_v51 = vshrl.u32 %v3135_v34, 16  ;;  %v436_v52 = vshll.u32 %v3135_v34, 16 }
  0x3e   : > { %2408 = vmatmul.mubr.msk.bf16.gmra.mrb[4].mxu0 %vm506_vm4, %v3137_v35  ;;  %2339 = vmatprep.mubr.msk.bf16.mxu1 %vm506_vm4, %v3137_v35  ;;  %v416_v47 = vrot.slane %v415_v37, 4  ;;  %v425_v48 = vor.u32 %v424_v38, %v420_v29  ;;  %v824_v44 = vsel %vm3103_vm7, %v2141_v20, %v823_v60  ;;  %v442_v55 = vshll.u32 %v3142_v40, 16 }
  0x3f   : > { %2421 = vmatprep.mubr.msk.bf16.mxu0 %vm506_vm4, %v3139_v36  ;;  %v827_v54 = vsel %vm3103_vm7, %v825_v41, %v826_v61  ;;  %v446_v56 = vshrl.u32 %v3142_v40, 16  ;;  %v435_v3 = vrot.slane %v433_v51, 4  ;;  %v438_v12 = vrot.slane %v436_v52, 5  ;;  %v3201_v41 = vld [vmem:[%s3586_s1 + $0xe] sm:$0x3] }
  0x40   : > { %v421_v59 = vsel %vm3014_vm3, %v416_v47, %v420_v29  ;;  %v426_v63 = vrot.slane %v425_v48, 4  ;;  %v3171_v1 = vcombine.low %v824_v44, %v827_v54  ;;  %v444_v60 = vrot.slane %v442_v55, 5 }
  0x41   : > { %v448_v11 = vrot.slane %v446_v56, 4  ;;  %v452_v43 = vshll.u32 %v3153_v50, 16  ;;  %v2142_v17 = vrot.slane %v3036_v57, 9  ;;  %v830_v18 = vrot.slane %v3044_v62, 5 }
  0x42   : > { %v431_v61 = vsel %vm3014_vm3, %v426_v63, %v430_v42  ;;  %v833_v19 = vrot.slane %v3049_v8, 5  ;;  %v439_v23 = vor.u32 %v438_v12, %v435_v3  ;;  %v457_v33 = vshrl.u32 %v3175_v16, 16 }
  0x43   : > { %v3185_v22 = vcombine.low %v421_v59, %v431_v61  ;;  %v449_v25 = vor.u32 %v448_v11, %v444_v60  ;;  %v454_v26 = vrot.slane %v452_v43, 5  ;;  %v831_v28 = vsel %vm3103_vm7, %v2142_v17, %v830_v18 }
  0x44   : > { %v832_v29 = vrot.slane %v830_v18, 4  ;;  %v460_v37 = vshll.u32 %v3175_v16, 16  ;;  %v440_v8 = vrot.slane %v439_v23, 4  ;;  %v466_v42 = vshll.u32 %v3183_v21, 16 }
  0x45   : > { %2340 = vmatmul.mubr.msk.bf16.gmra.mrb[8].mxu1 %vm506_vm4, %v3185_v22  ;;  %v450_v38 = vrot.slane %v449_v25, 4  ;;  %v470_v20 = vshrl.u32 %v3183_v21, 16  ;;  %v459_v48 = vrot.slane %v457_v33, 4  ;;  %v476_v52 = vshll.u32 %v3188_v27, 16 }
  0x46   : > { %2422 = vmatmul.mubr.msk.bf16.vlgmr.msra.gmra.mrb[0].mxu0 %vm506_vm4, %v3171_v1  ;;  %v834_v47 = vsel %vm3103_vm7, %v832_v29, %v833_v19  ;;  %v462_v51 = vrot.slane %v460_v37, 5  ;;  %v445_v44 = vsel %vm3014_vm3, %v440_v8, %v444_v60  ;;  %v468_v56 = vrot.slane %v466_v42, 5 }
  0x47   : > { %2438 = vmatpush3.bf16.msra.mxu0 %v1446_v46  ;;  %v455_v54 = vsel %vm3014_vm3, %v450_v38, %v454_v26  ;;  %v3212_v55 = vcombine.low %v831_v28, %v834_v47  ;;  %v472_v3 = vrot.slane %v470_v20, 4  ;;  %v478_v12 = vrot.slane %v476_v52, 5 }
  0x48   : > { %v3214_v59 = vcombine.low %v445_v44, %v455_v54  ;;  %v463_v63 = vor.u32 %v462_v51, %v459_v48  ;;  %2649 = vmatprep.subr.msk.bf16.mxu0 %vm531_vm0, %v3201_v41  ;;  %v2143_v46 = vrot.slane %v3052_v9, 9  ;;  %v837_v60 = vrot.slane %v3063_v24, 5  ;;  %v3249_v51 = vld [vmem:[%s2949_s16 + $0x64] sm:$0xf] }
  0x49   : > { %2425 = vmatprep.mubr.msk.bf16.mxu0 %vm506_vm4, %v3212_v55  ;;  %v840_v11 = vrot.slane %v3069_v32, 5  ;;  %v2144_v43 = vrot.slane %v3088_v53, 9  ;;  %v473_v17 = vor.u32 %v472_v3, %v468_v56  ;;  %v844_v18 = vrot.slane %v3099_v58, 5 }
  0x4a   : > { %2343 = vmatprep.mubr.msk.bf16.mxu1 %vm506_vm4, %v3214_v59  ;;  %v464_v61 = vrot.slane %v463_v63, 4  ;;  %v847_v19 = vrot.slane %v3113_v13, 5  ;;  %v838_v23 = vsel %vm3103_vm7, %v2143_v46, %v837_v60  ;;  %v839_v25 = vrot.slane %v837_v60, 4  ;;  %v3272_v60 = vld [vmem:[%s2949_s16 + $0x60] sm:$0xf] }
  0x4b   : > { %v2123_v26 = vcombine.low %v2973_v5, %v2976_v6  ;;  %v474_v28 = vrot.slane %v473_v17, 4  ;;  %v845_v29 = vsel %vm3103_vm7, %v2144_v43, %v844_v18  ;;  %v846_v33 = vrot.slane %v844_v18, 4 }
  0x4c   : > { %v469_v32 = vsel %vm3014_vm3, %v464_v61, %v468_v56  ;;  %v841_v37 = vsel %vm3103_vm7, %v839_v25, %v840_v11  ;;  %v2145_v13 = vrot.slane %v3135_v34, 9  ;;  %v851_v8 = vrot.slane %v3142_v40, 5  ;;  %v3275_v11 = vld [vmem:[%s2949_s16 + $0x68] sm:$0x1] }
  0x4d   : > { %v854_v38 = vrot.slane %v3153_v50, 5  ;;  %v479_v42 = vsel %vm3014_vm3, %v474_v28, %v478_v12  ;;  %v3243_v20 = vcombine.low %v838_v23, %v841_v37  ;;  %v848_v47 = vsel %vm3103_vm7, %v846_v33, %v847_v19 }
  0x4e   : > { %v2146_v48 = vrot.slane %v3175_v16, 9  ;;  %v3251_v52 = vcombine.low %v469_v32, %v479_v42  ;;  %v3253_v44 = vcombine.low %v845_v29, %v848_v47  ;;  %v853_v54 = vrot.slane %v851_v8, 4  ;;  %v2164_v29 = vld [vmem:[%s3586_s1 + $0x6] sm:$0x3] }
  0x4f   : > { %2426 = vmatmul.mubr.msk.bf16.gmra.mrb[4].mxu0 %vm506_vm4, %v3243_v20  ;;  %v858_v50 = vrot.slane %v3183_v21, 5  ;;  %v861_v56 = vrot.slane %v3188_v27, 5  ;;  %v852_v63 = vsel %vm3103_vm7, %v2145_v13, %v851_v8  ;;  %v1306_v12 = vrot.slane %v3249_v51, 5 }
  0x50   : > { %2344 = vmatmul.mubr.msk.bf16.gmra.mrb[12].mxu1 %vm506_vm4, %v3251_v52  ;;  %2429 = vmatprep.mubr.msk.bf16.mxu0 %vm506_vm4, %v3253_v44  ;;  %v855_v3 = vsel %vm3103_vm7, %v853_v54, %v854_v38  ;;  %v812_v43 = vrot.slane %v2980_v7, 5  ;;  %v3280_v61 = vcombine.low %v2992_v14, %v2995_v15  ;;  %v2139_v19 = vrot.slane %v2973_v5, 9 }
  0x51   : > { %2349 = vmatprep.mubr.msk.bf16.mxu1 %vm506_vm4, %v2123_v26  ;;  %v859_v46 = vsel %vm3103_vm7, %v2146_v48, %v858_v50  ;;  %v860_v27 = vrot.slane %v858_v50, 4  ;;  %v3282_v17 = vcombine.low %v852_v63, %v855_v3  ;;  %v809_v23 = vrot.slane %v2976_v6, 5 }
  0x52   : > { %v2184_v26 = vrot.slane %v3272_v60, 9  ;;  %v1308_v32 = vrot.slane %v1306_v12, 4  ;;  %v1309_v7 = vrot.slane %v3275_v11, 5  ;;  %v3294_v14 = vcombine.low %v3010_v30, %v3019_v39 }
  0x53   : > { %v862_v18 = vsel %vm3103_vm7, %v860_v27, %v861_v56  ;;  %v810_v15 = vsel %vm3103_vm7, %v2139_v19, %v809_v23  ;;  %v811_v28 = vrot.slane %v809_v23, 4  ;;  %v914_v5 = vsel %vm531_vm0, %v3085_v49, 0  ;;  %v283_v23 = vld [vmem:[%s2949_s16 + $0x74] sm:$0x1] }
  0x54   : > { %v3288_v25 = vcombine.low %v859_v46, %v862_v18  ;;  %v1307_v30 = vsel %vm3103_vm7, %v2184_v26, %v1306_v12  ;;  %v1310_v39 = vsel %vm3103_vm7, %v1308_v32, %v1309_v7  ;;  %v3322_v37 = vcombine.low %v3036_v57, %v3044_v62 }
  0x55   : > { %v813_v6 = vsel %vm3103_vm7, %v811_v28, %v812_v43  ;;  %v3318_v33 = vcombine.low %v1307_v30, %v1310_v39  ;;  %v3326_v13 = vcombine.low %v3052_v9, %v3063_v24  ;;  %v3338_v57 = vcombine.low %v3088_v53, %v3099_v58  ;;  %v2216_v24 = vld [vmem:[%s3586_s1 + $0x10] sm:$0x3] }
  0x56   : > { %v2148_v49 = vcombine.low %v810_v15, %v813_v6  ;;  %v1594_v62 = vsel %vm531_vm0, %v3201_v41, 0  ;;  %v3344_v9 = vcombine.low %v3135_v34, %v3142_v40  ;;  %v3360_v53 = vcombine.low %v3175_v16, %v3183_v21  ;;  %v3381_v40 = vld [vmem:[%s2949_s16 + $0x6c] sm:$0xf]  ;;  %v3384_v16 = vld [vmem:[%s2949_s16 + $0x70] sm:$0xf] }
  0x57   : > { %2430 = vmatmul.mubr.msk.bf16.gmra.mrb[8].mxu0 %vm506_vm4, %v3282_v17  ;;  %v3371_v58 = vcombine.low %v3272_v60, %v3249_v51  ;;  %v1040_v34 = vsel %vm531_vm0, %v2164_v29, 0  ;;  %v2196_v21 = vcombine.low %v3381_v40, %v3384_v16  ;;  %v1159_v41 = vshll.u32 %v3272_v60, 16 }
  0x58   : > { %2350 = vmatmul.mubr.msk.bf16.vlgmr.msra.gmra.mrb[0].mxu1 %vm506_vm4, %v3280_v61  ;;  %2433 = vmatprep.mubr.msk.bf16.mxu0 %vm506_vm4, %v3288_v25  ;;  %v1169_v8 = vshrl.u32 %v3249_v51, 16  ;;  %v1726_v38 = vsel %vm531_vm0, %v2216_v24, 0  ;;  %v1565_v50 = vshll.u32 %v3381_v40, 16  ;;  %v1575_v56 = vshrl.u32 %v3384_v16, 16 }
  0x59   : > { %2366 = vmatpush3.bf16.msra.mxu1 %v914_v5  ;;  %2353 = vmatprep.mubr.msk.bf16.mxu1 %vm506_vm4, %v3294_v14  ;;  %v1161_v47 = vrot.slane %v1159_v41, 5  ;;  %v1175_v3 = vshll.u32 %v3275_v11, 16  ;;  %v1581_v11 = vshll.u32 %v283_v23, 16  ;;  %v2215_v31 = vrot.slane %v3381_v40, 9 }
  0x5a   : > { %2644 = vmatprep.subr.msk.bf16.mxu1 %vm531_vm0, %v2164_v29  ;;  %v1171_v54 = vrot.slane %v1169_v8, 4  ;;  %v1567_v46 = vrot.slane %v1565_v50, 5  ;;  %vm2842_vm8 = vmmov (!%p2227_p0), 0  }
  0x5b   : > { %v1177_v19 = vrot.slane %v1175_v3, 5  ;;  %v1583_v6 = vrot.slane %v1581_v11, 5 }
  0x5f   : > { %2434 = vmatmul.mubr.msk.bf16.gmra.mrb[12].mxu0 %vm506_vm4, %v3318_v33 }
  0x60   : > { %2354 = vmatmul.mubr.msk.bf16.gmra.mrb[4].mxu1 %vm506_vm4, %v3322_v37  ;;  %2439 = vmatprep.mubr.msk.bf16.mxu0 %vm506_vm4, %v3294_v14 }
  0x61   : > { %2357 = vmatprep.mubr.msk.bf16.mxu1 %vm506_vm4, %v3326_v13 }
  0x67   : > { %2440 = vmatmul.mubr.msk.bf16.vlgmr.msra.gmra.mrb[0].mxu0 %vm506_vm4, %v3322_v37 }
  0x68   : > { %2358 = vmatmul.mubr.msk.bf16.gmra.mrb[8].mxu1 %vm506_vm4, %v3338_v57  ;;  %2456 = vmatpush3.bf16.msra.mxu0 %v1594_v62 }
  0x69   : > { %2361 = vmatprep.mubr.msk.bf16.mxu1 %vm506_vm4, %v3344_v9  ;;  %2443 = vmatprep.mubr.msk.bf16.mxu0 %vm506_vm4, %v3326_v13 }
  0x6a   : > { %2650 = vmatprep.subr.msk.bf16.mxu0 %vm531_vm0, %v2216_v24 }
  0x6f   : > { %2444 = vmatmul.mubr.msk.bf16.gmra.mrb[4].mxu0 %vm506_vm4, %v3338_v57 }
  0x70   : > { %2362 = vmatmul.mubr.msk.bf16.gmra.mrb[12].mxu1 %vm506_vm4, %v3360_v53  ;;  %2447 = vmatprep.mubr.msk.bf16.mxu0 %vm506_vm4, %v3344_v9 }
  0x71   : > { %2367 = vmatprep.mubr.msk.bf16.mxu1 %vm506_vm4, %v2148_v49 }
  0x77   : > { %2448 = vmatmul.mubr.msk.bf16.gmra.mrb[8].mxu0 %vm506_vm4, %v3360_v53 }
  0x78   : > { %2368 = vmatmul.mubr.msk.bf16.vlgmr.msra.gmra.mrb[0].mxu1 %vm506_vm4, %v3139_v36  ;;  %2451 = vmatprep.mubr.msk.bf16.mxu0 %vm506_vm4, %v3371_v58  ;;  %v1156_v36 = vshrl.u32 %v3272_v60, 16  ;;  %v1577_v60 = vrot.slane %v1575_v56, 4 }
  0x79   : > { %2384 = vmatpush3.bf16.msra.mxu1 %v1040_v34  ;;  %2371 = vmatprep.mubr.msk.bf16.mxu1 %vm506_vm4, %v3171_v1 }
  0x7a   : > { %2646 = vmatprep.subr.msk.bf16.mxu1 %vm531_vm0, %v2962_v2  ;;  %v1165_v2 = vshll.u32 %v3249_v51, 16  ;;  %v1158_v42 = vrot.slane %v1156_v36, 4  ;;  %v1571_v51 = vshll.u32 %v3384_v16, 16 }
  0x7c   : > { %v1167_v48 = vrot.slane %v1165_v2, 5  ;;  %v1573_v27 = vrot.slane %v1571_v51, 5 }
  0x7e   : > { %v1172_v63 = vor.u32 %v1171_v54, %v1167_v48  ;;  %v1578_v26 = vor.u32 %v1577_v60, %v1573_v27 }
  0x7f   : > { %2452 = vmatmul.mubr.msk.bf16.gmra.mrb[12].mxu0 %vm506_vm4, %v2196_v21 }
  0x80   : > { %2372 = vmatmul.mubr.msk.bf16.gmra.mrb[4].mxu1 %vm506_vm4, %v3212_v55  ;;  %2457 = vmatprep.mubr.msk.bf16.mxu0 %vm506_vm4, %v3079_v45  ;;  %v1562_v45 = vshrl.u32 %v3381_v40, 16  ;;  %v1173_v18 = vrot.slane %v1172_v63, 4  ;;  %v1579_v5 = vrot.slane %v1578_v26, 4 }
  0x81   : > { %2375 = vmatprep.mubr.msk.bf16.mxu1 %vm506_vm4, %v3243_v20 }
  0x82   : > { %v1564_v12 = vrot.slane %v1562_v45, 4  ;;  %v1178_v7 = vsel %vm3014_vm3, %v1173_v18, %v1177_v19  ;;  %v1584_v29 = vsel %vm3014_vm3, %v1579_v5, %v1583_v6 }
  0x87   : > { %2458 = vmatmul.mubr.msk.bf16.vlgmr.msra.gmra.mrb[0].mxu0 %vm506_vm4, %v3109_v10  ;;  %v1162_v10 = vor.u32 %v1161_v47, %v1158_v42 }
  0x88   : > { %2376 = vmatmul.mubr.msk.bf16.gmra.mrb[8].mxu1 %vm506_vm4, %v3253_v44  ;;  %2474 = vmatpush3.bf16.msra.mxu0 %v1726_v38 }
  0x89   : > { %2379 = vmatprep.mubr.msk.bf16.mxu1 %vm506_vm4, %v3282_v17  ;;  %2461 = vmatprep.mubr.msk.bf16.mxu0 %vm506_vm4, %v3137_v35  ;;  %v1163_v43 = vrot.slane %v1162_v10, 4  ;;  %v1568_v35 = vor.u32 %v1567_v46, %v1564_v12 }
  0x8b   : > { %v1168_v32 = vsel %vm3014_vm3, %v1163_v43, %v1167_v48  ;;  %v1569_v28 = vrot.slane %v1568_v35, 4 }
  0x8c   : > { %v2175_v15 = vcombine.low %v1168_v32, %v1178_v7 }
  0x8f   : > { %2462 = vmatmul.mubr.msk.bf16.gmra.mrb[4].mxu0 %vm506_vm4, %v3185_v22 }
  0x90   : > { %2380 = vmatmul.mubr.msk.bf16.gmra.mrb[12].mxu1 %vm506_vm4, %v3288_v25  ;;  %2465 = vmatprep.mubr.msk.bf16.mxu0 %vm506_vm4, %v3214_v59 }
  0x91   : > { %2385 = vmatprep.mubr.msk.bf16.mxu1 %vm506_vm4, %v3280_v61  ;;  %v1574_v61 = vsel %vm3014_vm3, %v1569_v28, %v1573_v27 }
  0x92   : > { %v2206_v30 = vcombine.low %v1574_v61, %v1584_v29 }
  0x97   : > { %2466 = vmatmul.mubr.msk.bf16.gmra.mrb[8].mxu0 %vm506_vm4, %v3251_v52 }
  0x98   : > { %2386 = vmatmul.mubr.msk.bf16.vlgmr.msra.gmra.mrb[0].mxu1 %vm506_vm4, %v3294_v14  ;;  %2469 = vmatprep.mubr.msk.bf16.mxu0 %vm506_vm4, %v2175_v15 }
  0x99   : > { %2512 = vmatpush3.bf16.msra.mxu1 %v2970_v4  ;;  %2389 = vmatprep.mubr.msk.bf16.mxu1 %vm506_vm4, %v3322_v37  ;;  %v1712_v4 = vrot.slane %v3384_v16, 5 }
  0x9f   : > { %2470 = vmatmul.mubr.msk.bf16.gmra.mrb[12].mxu0 %vm506_vm4, %v2206_v30 }
  0xa0   : > { %2390 = vmatmul.mubr.msk.bf16.gmra.mrb[4].mxu1 %vm506_vm4, %v3326_v13  ;;  %2475 = vmatprep.mubr.msk.bf16.mxu0 %vm506_vm4, %v3171_v1  ;;  %v1714_v1 = vrot.slane %v1712_v4, 4 }
  0xa1   : > { %2393 = vmatprep.mubr.msk.bf16.mxu1 %vm506_vm4, %v3338_v57 }
  0xa7   : > { %2476 = vmatmul.mubr.msk.bf16.vlgmr.msra.gmra.mrb[0].mxu0 %vm506_vm4, %v3212_v55  ;;  %v1715_v55 = vrot.slane %v283_v23, 5 }
  0xa8   : > { %2394 = vmatmul.mubr.msk.bf16.gmra.mrb[8].mxu1 %vm506_vm4, %v3344_v9  ;;  %2479 = vmatprep.mubr.msk.bf16.mxu0 %vm506_vm4, %v3243_v20  ;;  %v1713_v20 = vsel %vm3103_vm7, %v2215_v31, %v1712_v4 }
  0xa9   : > { %2397 = vmatprep.mubr.msk.bf16.mxu1 %vm506_vm4, %v3360_v53 }
  0xaf   : > { %2480 = vmatmul.mubr.msk.bf16.gmra.mrb[4].mxu0 %vm506_vm4, %v3253_v44  ;;  %v1716_v44 = vsel %vm3103_vm7, %v1714_v1, %v1715_v55 }
  0xb0   : > { %2398 = vmatmul.mubr.msk.bf16.gmra.mrb[12].mxu1 %vm506_vm4, %v3371_v58  ;;  %2483 = vmatprep.mubr.msk.bf16.mxu0 %vm506_vm4, %v3282_v17 }
  0xb1   : > { %2411 = vmatprep.mubr.msk.bf16.mxu1 %vm506_vm4, %v3185_v22  ;;  %v2217_v22 = vcombine.low %v1713_v20, %v1716_v44 }
  0xb7   : > { %2484 = vmatmul.mubr.msk.bf16.gmra.mrb[8].mxu0 %vm506_vm4, %v3288_v25 }
  0xb8   : > { %2412 = vmatmul.mubr.msk.bf16.vlgmr.msra.gmra.mrb[8].mxu1 %vm506_vm4, %v3214_v59  ;;  %2487 = vmatprep.mubr.msk.bf16.mxu0 %vm506_vm4, %v3318_v33 }
  0xb9   : > { %2415 = vmatprep.mubr.msk.bf16.mxu1 %vm506_vm4, %v3251_v52 }
  0xbf   : > { %2488 = vmatmul.mubr.msk.bf16.gmra.mrb[12].mxu0 %vm506_vm4, %v2217_v22 }
  0xc0   : > { %2416 = vmatmul.mubr.msk.bf16.gmra.mrb[12].mxu1 %vm506_vm4, %v2175_v15 }
 0x16b   : > { %v2387_v17 = vpop.f32.mrb[0].mxu1 }
 0x16c   : > { %v1076_v25 = vpop.f32.mrb[1].mxu1 }
 0x16d   : > { %v2388_v59 = vpop.f32.mrb[2].mxu1 }
 0x16e   : > { %v1079_v14 = vpop.f32.mrb[3].mxu1 }
 0x173   : > { %v2391_v39 = vpop.f32.mrb[4].mxu1 }
 0x174   : > { %v1092_v49 = vpop.f32.mrb[5].mxu1 }
 0x175   : > { %v2392_v33 = vpop.f32.mrb[6].mxu1 }
 0x176   : > { %v1095_v37 = vpop.f32.mrb[7].mxu1 }
 0x17a   : > { %v2477_v13 = vpop.f32.mrb[0].mxu0 }
 0x17b   : > { %v2513_v57 = vadd.f32 %v2477_v13, %v2387_v17  ;;  %v1762_v52 = vpop.f32.mrb[1].mxu0 }
 0x17c   : > { %v2514_v62 = vadd.f32 %v1762_v52, %v1076_v25  ;;  %v2478_v9 = vpop.f32.mrb[2].mxu0 }
 0x17d   : > { %v2515_v24 = vadd.f32 %v2478_v9, %v2388_v59  ;;  %v1765_v53 = vpop.f32.mrb[3].mxu0  ;;  %v1850_v40 = vadd.f32 %v2513_v57, %v3484_v0 }
 0x17e   : > { %v1848_v58 = vadd.f32 %v2514_v62, %v3484_v0  ;;  %v2516_v34 = vadd.f32 %v1765_v53, %v1079_v14 }
 0x17f   : > { %v1851_v36 = vadd.f32 %v2515_v24, %v3484_v0  ;;  %v1866_v42 = vmax.f32 %v1850_v40, 0.0 }
 0x180   : > { %v1849_v16 = vadd.f32 %v2516_v34, %v3484_v0  ;;  %v1864_v21 = vmax.f32 %v1848_v58, 0.0 }
 0x181   : > { %v1867_v56 = vmax.f32 %v1851_v36, 0.0 }
 0x182   : > { %v1865_v41 = vmax.f32 %v1849_v16, 0.0  ;;  %v2481_v2 = vpop.f32.mrb[4].mxu0 }
 0x183   : > { %v2517_v8 = vadd.f32 %v2481_v2, %v2391_v39  ;;  %v1778_v38 = vpop.f32.mrb[5].mxu0 }
 0x184   : > { %v1881_v47 = vadd.f32 %v1865_v41, %v1864_v21  ;;  %v2518_v48 = vadd.f32 %v1778_v38, %v1092_v49  ;;  %v2482_v54 = vpop.f32.mrb[6].mxu0 }
 0x185   : > { %v2519_v45 = vadd.f32 %v2482_v54, %v2392_v33  ;;  %v1781_v50 = vpop.f32.mrb[7].mxu0  ;;  %v1854_v3 = vadd.f32 %v2517_v8, %v3484_v0 }
 0x186   : > { %v1882_v51 = vadd.f32 %v1881_v47, %v1866_v42  ;;  %v1852_v10 = vadd.f32 %v2518_v48, %v3484_v0  ;;  %v2520_v63 = vadd.f32 %v1781_v50, %v1095_v37 }
 0x187   : > { %v1855_v43 = vadd.f32 %v2519_v45, %v3484_v0  ;;  %v1870_v26 = vmax.f32 %v1854_v3, 0.0 }
 0x188   : > { %v1868_v12 = vmax.f32 %v1852_v10, 0.0  ;;  %v1883_v46 = vadd.f32 %v1882_v51, %v1867_v56  ;;  %v1853_v27 = vadd.f32 %v2520_v63, %v3484_v0 }
 0x189   : > { %v1871_v61 = vmax.f32 %v1855_v43, 0.0  ;;  %v2841_v43 = vmov (!%p2227_p0), 0.0  }
 0x18a   : > { %v1884_v60 = vadd.f32 %v1883_v46, %v1868_v12  ;;  %v1869_v18 = vmax.f32 %v1853_v27, 0.0  ;;  %v2485_v19 = vpop.f32.mrb[8].mxu0  ;;  %v1880_v46 = vld [vmem:[#allocation2] sm:$0x1]  ;;  %2491 = vmatprep.subr.bf16.mxu0 (!%p2227_p0), %v2841_v43  ;;  %2507 = vmatprep.mubr.msk.bf16.mxu0 (!%p2227_p0), %vm2842_vm8, %v2841_v43 }
 0x18b   : > { %v2413_v23 = vpop.f32.mrb[8].mxu1  ;;  %v1794_v35 = vpop.f32.mrb[9].mxu0 }
 0x18c   : > { %v1885_v11 = vadd.f32 %v1884_v60, %v1869_v18  ;;  %v2521_v32 = vadd.f32 %v2485_v19, %v2413_v23  ;;  %v1256_v7 = vpop.f32.mrb[9].mxu1  ;;  %v2486_v15 = vpop.f32.mrb[10].mxu0  ;;  %v2737_v18 = vld [vmem:[%s3588_s3 + $0x8] sm:$0xff] (!%p2227_p0)   ;;  %v2738_v19 = vld [vmem:[%s3588_s3 + $0x10] sm:$0xff] (!%p2227_p0)   ;;  %v2739_v23 = vld [vmem:[%s3588_s3 + $0x18] sm:$0xff] (!%p2227_p0)  }
 0x18d   : > { %v2522_v28 = vadd.f32 %v1794_v35, %v1256_v7  ;;  %v2414_v5 = vpop.f32.mrb[10].mxu1  ;;  %v1797_v6 = vpop.f32.mrb[11].mxu0  ;;  %v2740_v35 = vld [vmem:[%s3588_s3 + $0x20] sm:$0xff] (!%p2227_p0)  }
 0x18e   : > { %v1886_v29 = vadd.f32 %v1885_v11, %v1870_v26  ;;  %v2523_v30 = vadd.f32 %v2486_v15, %v2414_v5  ;;  %v1259_v4 = vpop.f32.mrb[11].mxu1  ;;  %v1858_v20 = vadd.f32 %v2521_v32, %v3484_v0  ;;  %v2741_v26 = vld [vmem:[%s3588_s3 + $0x28] sm:$0xff] (!%p2227_p0)   ;;  %v2742_v11 = vld [vmem:[%s3588_s3 + $0x30] sm:$0xff] (!%p2227_p0)   ;;  %v2743_v15 = vld [vmem:[%s3588_s3 + $0x38] sm:$0xff] (!%p2227_p0)  }
 0x18f   : > { %v1856_v31 = vadd.f32 %v2522_v28, %v3484_v0  ;;  %v2524_v1 = vadd.f32 %v1797_v6, %v1259_v4  ;;  %v1927_v5 = vld [vmem:[%s3589_s4] sm:$0x1] (!%p2227_p0) }
 0x190   : > { %v1887_v55 = vadd.f32 %v1886_v29, %v1871_v61  ;;  %v1859_v59 = vadd.f32 %v2523_v30, %v3484_v0  ;;  %v1874_v57 = vmax.f32 %v1858_v20, 0.0 }
 0x191   : > { %v1872_v44 = vmax.f32 %v1856_v31, 0.0  ;;  %v1857_v22 = vadd.f32 %v2524_v1, %v3484_v0 }
 0x192   : > { %v2489_v17 = vpop.f32.mrb[12].mxu0  ;;  %v1875_v34 = vmax.f32 %v1859_v59, 0.0 }
 0x193   : > { %v1888_v25 = vadd.f32 %v1887_v55, %v1872_v44  ;;  %v1873_v14 = vmax.f32 %v1857_v22, 0.0  ;;  %v2417_v39 = vpop.f32.mrb[12].mxu1  ;;  %v1810_v49 = vpop.f32.mrb[13].mxu0 }
 0x194   : > { %v2525_v33 = vadd.f32 %v2489_v17, %v2417_v39  ;;  %v1272_v37 = vpop.f32.mrb[13].mxu1  ;;  %v2490_v13 = vpop.f32.mrb[14].mxu0 }
 0x195   : > { %v1889_v52 = vadd.f32 %v1888_v25, %v1873_v14  ;;  %v2526_v62 = vadd.f32 %v1810_v49, %v1272_v37  ;;  %v2418_v9 = vpop.f32.mrb[14].mxu1  ;;  %v1813_v24 = vpop.f32.mrb[15].mxu0 }
 0x196   : > { %v2527_v53 = vadd.f32 %v2490_v13, %v2418_v9  ;;  %v1275_v58 = vpop.f32.mrb[15].mxu1  ;;  %v1862_v36 = vadd.f32 %v2525_v33, %v3484_v0 }
 0x197   : > { %v1890_v40 = vadd.f32 %v1889_v52, %v1874_v57  ;;  %v1860_v16 = vadd.f32 %v2526_v62, %v3484_v0  ;;  %v2528_v21 = vadd.f32 %v1813_v24, %v1275_v58 }
 0x198   : > { %v1863_v42 = vadd.f32 %v2527_v53, %v3484_v0  ;;  %v1878_v48 = vmax.f32 %v1862_v36, 0.0 }
 0x199   : > { %v1876_v41 = vmax.f32 %v1860_v16, 0.0  ;;  %v1891_v2 = vadd.f32 %v1890_v40, %v1875_v34  ;;  %v1861_v8 = vadd.f32 %v2528_v21, %v3484_v0  ;;  %v2736_v0 = vld [vmem:[%s3588_s3] sm:$0xff] (!%p2227_p0)  }
 0x19a   : > { %v1879_v45 = vmax.f32 %v1863_v42, 0.0  ;;  %2492 = vmatpush3.bf16.msra.mxu0 (!%p2227_p0), %v2736_v0 }
 0x19b   : > { %v1892_v38 = vadd.f32 %v1891_v2, %v1876_v41  ;;  %v1877_v47 = vmax.f32 %v1861_v8, 0.0  ;;  %2493 = vmatprep.subr.bf16.mxu0 (!%p2227_p0), %v2841_v43 }
 0x19d   : > { %v1893_v54 = vadd.f32 %v1892_v38, %v1877_v47 }
 0x19e   : > { %2494 = vmatpush3.bf16.msra.mxu0 (!%p2227_p0), %v2737_v18 }
 0x19f   : > { %v1894_v50 = vadd.f32 %v1893_v54, %v1878_v48  ;;  %2495 = vmatprep.subr.bf16.mxu0 (!%p2227_p0), %v2841_v43 }
 0x1a1   : > { %v1895_v56 = vadd.f32 %v1894_v50, %v1879_v45 }
 0x1a2   : > { %2496 = vmatpush3.bf16.msra.mxu0 (!%p2227_p0), %v2738_v19 }
 0x1a3   : > { %v1896_v51 = vrot.slane %v1895_v56, 4  ;;  %2497 = vmatprep.subr.bf16.mxu0 (!%p2227_p0), %v2841_v43 }
 0x1a5   : > { %v1897_v10 = vadd.f32 %v1896_v51, %v1895_v56 }
 0x1a6   : > { %2498 = vmatpush3.bf16.msra.mxu0 (!%p2227_p0), %v2739_v23 }
 0x1a7   : > { %v1898_v63 = vrot.slane %v1897_v10, 2  ;;  %2499 = vmatprep.subr.bf16.mxu0 (!%p2227_p0), %v2841_v43 }
 0x1a9   : > { %v1899_v3 = vadd.f32 %v1898_v63, %v1897_v10 }
 0x1aa   : > { %2500 = vmatpush3.bf16.msra.mxu0 (!%p2227_p0), %v2740_v35 }
 0x1ab   : > { %v1900_v12 = vrot.slane %v1899_v3, 1  ;;  %1907 = sbr.rel (%p2227_p0) target bundleno = 660 (0x294), region = 48  ;;  %2501 = vmatprep.subr.bf16.mxu0 (!%p2227_p0), %v2841_v43 }
 0x1ad   : > { %v1901_v27 = vadd.f32 %v1900_v12, %v1899_v3 }
 0x1ae   : > { %2502 = vmatpush3.bf16.msra.mxu0 (!%p2227_p0), %v2741_v26 }
 0x1af   : > { %v1902_v60 = vadd.f32 %v1901_v27, %v1880_v46  ;;  %2503 = vmatprep.subr.bf16.mxu0 (!%p2227_p0), %v2841_v43 }
 0x1b1   : > { %1903 = vst [vmem:[#allocation2] sm:$0x1] %v1902_v60 }
 0x1b2   : > { %2504 = vmatpush3.bf16.msra.mxu0 %v2742_v11 }
 0x1b3   : > { %2505 = vmatprep.subr.bf16.mxu0 %v2841_v43 }
 0x1b6   : > { %2506 = vmatpush3.bf16.msra.mxu0 %v2743_v15 }
 0x1b8   : > { %v1908_v32 = vld [vmem:[#allocation2] sm:$0x1] }
 0x1b9   : > { %v1909_v7 = vmul.f32 0.00390625, %v1908_v32 }
 0x1bb   : > { %v1910_v28 = vpack.c.bf16 %v1909_v7, %v1909_v7 }
 0x1bd   : > { %2508 = vmatmul.mubr.bf16.vlgmr.msra.gmra.mrb[0].mxu0 %v1910_v28 }
 0x290   : > { %v2010_v6 = vpop.f32.mrb[0].mxu0 }
 0x291   : > { %v2011_v61 = vadd.f32 %v2010_v6, %v1927_v5  ;;  %v2509_v29 = vpop.f32.mrb[1].mxu0 }
 0x292   : > { %v2013_v30 = vpop.f32.mrb[2].mxu0 }
 0x293   : > { %2016 = vst [vmem:[%s2953_s17] sm:$0x1] %v2011_v61  ;;  %v2510_v4 = vpop.f32.mrb[3].mxu0 }
 0x294 PF: > { %s2236_s14 = sshll.u32 %s2826_s22, 4  ;;  %s2030_s27 = sshll.u32 %s2953_s17, 4  ;;  %s2031_s27 = int_to_ptr.vmem [resolvable:$true] %s2030_s27 }
 0x295   : > { %s3535_s26 = scalar_lea.hbm %s3590_s5, %s2236_s14  ;;  %s2018_s7 = scalar_lea.sflag [#allocation4], %s237_s10 }
 0x296   : > { %s2744_s8 = scalar_lea.vmem %s2031_s27, 16  ;;  %s2843_s11 = smov [#allocation3]  }
 0x297   : > { %p2745_p1 = scmp.ne.s32.totalorder %s2031_s27, %s2744_s8  ;;  %s2748_s12 = sshll.u32 %s2843_s11, 4  ;;  %s2749_s12 = int_to_ptr.vmem [resolvable:$false] %s2748_s12 }
 0x298   : > { %s2750_s13 = scalar_lea.vmem %s2749_s12, 32  ;;  %p2751_p5 = scmp.lt.s32.totalorder %s2031_s27, %s2749_s12 }
 0x299   : > { %p2746_p2 = pnand %p2745_p1, %p2923_p3  ;;  %p2752_p6 = scmp.lt.s32.totalorder %s2750_s13, %s2744_s8 }
 0x29b   : > { %p2747_p4 = pneg %p2746_p2  ;;  %p2753_p7 = por %p2752_p6, %p2751_p5 }
 0x29d   : > { %p2754_p8 = pnand %p2753_p7, %p2747_p4 }
 0x29f   : > { %2757 = shalt.err (!%p2754_p8)
}
 0x2a0   : > { %s2758_s22 = scalar_lea.hbm %s3535_s26, 16  ;;  %s2762_s21 = scalar_lea.hbm %s3590_s5, 32 }
 0x2a1   : > { %p2759_p10 = scmp.ne.s32.totalorder %s3535_s26, %s2758_s22  ;;  %p2763_p13 = scmp.lt.u32.totalorder %s3535_s26, %s3590_s5 }
 0x2a2   : > { %p2764_p0 = scmp.lt.u32.totalorder %s2762_s21, %s2758_s22  ;;  %p2766_p2 = scmp.lt.u32.totalorder %s2758_s22, %s3535_s26 }
 0x2a3   : > { %p2760_p11 = pnand %p2759_p10, %p2923_p3 }
 0x2a4   : > { %p2765_p1 = por %p2764_p0, %p2763_p13 }
 0x2a5   : > { %p2761_p12 = pneg %p2760_p11 }
 0x2a6   : > { %p2767_p4 = por %p2766_p2, %p2765_p1 }
 0x2a8   : > { %p2768_p5 = pnand %p2767_p4, %p2761_p12 }
 0x2aa   : > { %2771 = shalt.err (!%p2768_p5)
}
 0x2ab   : > { %2652 = dma.vmem_to_hbm [thread:$0]  (%p2923_p3), %s2031_s27, 16, %s3535_s26, %s2018_s7  }
 0x2ac PF: > { %p2658_p6 = scmp.ge.s32.totalorder %s2838_s25, 2  ;;  %s2042_s16 = sand.u32 1, %s2810_s18  }
 0x2ad   : > { %s2043_s8 = scalar_lea.sflag [#allocation4], %s2042_s16 }
 0x2ae   : > { %p2655_p7 = pnand %p2658_p6, %p2933_p9 }
 0x2b0   : > { %2805 = dma.done.wait (!%p2655_p7), %s2043_s8, 16  }
 0x2b1   : > { %2807 = vsyncadd (!%p2655_p7), %s2043_s8, 4294967280  ;;  %s18_s25 = sadd.s32 1, %s2838_s25   ;;  %s3597_s18 = smov %s2814_s19 }
 0x2b2   : > { %p15_p8 = scmp.ge.s32.totalorder %s18_s25, 6   ;;  %s3598_s19 = smov %s2818_s20 }
 0x2b3   : > { %s3599_s20 = smov %s2941_s9  ;;  %s3600_s21 = smov %s2830_s23 }
 0x2b4   : > { %s3601_s22 = smov %s2834_s24  ;;  %s3602_s23 = smov %s3605_s28 }
 0x2b5   : > { %s3603_s24 = smov %s3609_s29  ;;  %17 = sbr.rel (!%p15_p8) target bundleno = 5 (0x5), region = 91 }
 0x2bc   :  { %2047 = vsyncpa [#allocation4], 1 }
 0x2bd   :  { %2049 = vsyncpa [#allocation4 + $0x1], 1 }

</bundles_post_ra>
